<compile_context>
chip_gen: v6e
topology: v6e:2x2x1
jax: 0.10.0
libtpu: 0.0.40
codegen_flags: <defaults>
</compile_context>

<pallas_src>
import functools

import numpy as np
import jax
import jax.numpy as jnp
from jax.experimental import pallas as pl
from jax.experimental.pallas import tpu as pltpu

NEG = -1.0e30  # "log zero" that stays finite in f32 arithmetic


def _round_up(x, m):
    return ((x + m - 1) // m) * m


# ------------------------------ kernel A -------------------------------------
def _row_logprob_kernel(x_ref, lbl_ref, out_ref, *, blank_idx):
    """Per packed row: out[:, 0] = log P(blank), out[:, 1] = log P(label)."""
    x = x_ref[...].astype(jnp.float32)                      # (C, V)
    lbl = lbl_ref[...]                                      # (C, 1) int32
    m = jnp.max(x, axis=-1, keepdims=True)
    lse = m + jnp.log(jnp.sum(jnp.exp(x - m), axis=-1, keepdims=True))
    v_iota = jax.lax.broadcasted_iota(jnp.int32, x.shape, 1)
    emit = jnp.sum(jnp.where(v_iota == lbl, x, 0.0), axis=-1, keepdims=True)
    blank = x[:, blank_idx:blank_idx + 1]                   # static lane slice
    out_ref[...] = jnp.concatenate([blank - lse, emit - lse], axis=-1)


# ------------------------------ kernel B -------------------------------------
def _logaddexp(a, b):
    # one exp + one log: EUP is the critical unit of the recursion.
    m = jnp.maximum(a, b)
    return m + jnp.log(1.0 + jnp.exp(-jnp.abs(a - b)))


def _shift_right(x, s, fill):
    # out[..., u] = x[..., u - s] for u >= s else fill (static s).
    n = x.shape[-1]
    if s >= n:
        return jnp.full_like(x, fill)
    pad = jnp.full(x.shape[:-1] + (s,), fill, x.dtype)
    return jnp.concatenate([pad, x[..., :n - s]], axis=-1)


def _row_scan(c, e):
    """Solve row[u] = logaddexp(c[u], row[u-1] + e[u-1]), row[0] = c[0].

    Closed form: row[u] = E[u] + logsumexp_{k<=u}(c[k] - E[k]) where E is the
    exclusive prefix sum of e.  Both scans are ceil(log2(U1))-step
    Hillis-Steele sweeps (whole-row vector ops).
    """
    n = c.shape[-1]
    E = _shift_right(e, 1, 0.0)            # exclusive prefix-sum of e (VPU only)
    s = 1
    while s < n:
        E = E + _shift_right(E, s, 0.0)
        s *= 2
    d = c - E
    L = d                                  # inclusive log-cum-sum-exp of d
    s = 1
    while s < n:
        L = _logaddexp(L, _shift_right(L, s, NEG))
        s *= 2
    # clip keeps padded-lane garbage finite; valid alphas always lie in [NEG, 0].
    return jnp.clip(E + L, NEG, -NEG)


def _alpha_kernel(maxf_ref, blank_ref, emit_ref, f_ref, g_ref, out_ref):
    """Transducer forward recursion for BS samples batched on sublanes."""
    bg = pl.program_id(0)
    t_max = maxf_ref[bg]                   # max valid frame count in this group

    f = f_ref[...]                         # (BS, U1) int32, f_len broadcast
    g = g_ref[...]                         # (BS, U1) int32, y_len broadcast
    u_iota = jax.lax.broadcasted_iota(jnp.int32, f.shape, 1)
    sel_u = u_iota == g

    # t = 0: alpha[0,0] = 0, alpha[0,u] = alpha[0,u-1] + emit[0,u-1]
    c0 = jnp.where(u_iota == 0, 0.0, NEG).astype(jnp.float32)
    e0 = emit_ref[0]
    b0 = blank_ref[0]
    row0 = _row_scan(c0, e0)
    acc0 = jnp.where(sel_u & (f == 1), row0 + b0, 0.0)

    def body(t, carry):
        prev, blank_prev, acc = carry
        e_t = emit_ref[t]                  # dynamic leading-axis loads
        blank_t = blank_ref[t]
        row = _row_scan(prev + blank_prev, e_t)
        acc = acc + jnp.where(sel_u & (f == t + 1), row + blank_t, 0.0)
        return row, blank_t, acc

    _, _, acc = jax.lax.fori_loop(1, t_max, body, (row0, b0, acc0))
    # per-sample NLL = -(alpha[f-1, g] + blank[f-1, g]); exactly one lane set
    # per sublane (zero for padded samples, which the wrapper discards).
    out_ref[...] = -jnp.sum(acc, axis=-1, keepdims=True)


# ------------------------------- wrapper --------------------------------------
class ApexTransducerLossPallas:
    """JAX/Pallas equivalent of apexTransducerLoss.forward (mean RNN-T loss)."""

    BS = 8  # samples per grid step in the recursion kernel (sublane batch)

    def __init__(self, blank_idx, precision, packed_input=True):
        self.blank_idx = int(blank_idx)
        self.precision = precision
        self.packed_input = packed_input

    def __call__(self, logits, logit_lens, y, y_lens, dict_meta_data=None):
        # The torch module upcasts logits to fp32 when precision == 'fp32'.
        # Both kernels compute in fp32 internally, so we keep the original
        # dtype in HBM (halves DMA for bf16/fp16 inputs) — numerically identical.
        f_len = logit_lens.astype(jnp.int32)
        g_len = y_lens.astype(jnp.int32)
        y = y.astype(jnp.int32)
        B, U = y.shape
        U1 = U + 1
        V = int(logits.shape[-1])

        y_pad = jnp.concatenate([y, jnp.zeros((B, 1), jnp.int32)], axis=1)  # (B,U1)

        if self.packed_input:
            T = int(dict_meta_data['max_f_len'])
            batch_offset = dict_meta_data['batch_offset'].astype(jnp.int32)
            starts = batch_offset - f_len * (g_len + 1)                   # (B,)
            rows = logits.reshape(-1, V)
        else:
            T = int(logits.shape[1])
            rows = logits.reshape(-1, V)
        N = int(rows.shape[0])

        # -------- kernel A: packed rows -> (blank_lp, emit_lp) per row --------
        # chunk sized so a f32 (chunk, V) working tile is ~2 MiB (fits 16 MiB
        # scoped VMEM on v5e and 64 MiB physical VMEM on v7x with headroom).
        # TODO(synk): for very large V (>=16k) additionally tile V with an
        # online logsumexp accumulation.
        chunk = max(8, min(2048, ((2 * 1024 * 1024) // (4 * V)) // 8 * 8))
        chunk = min(chunk, _round_up(N, 8))
        n_pad = _round_up(N, chunk)
        rows_p = jnp.pad(rows, ((0, n_pad - N), (0, 0)))

        # per-row label: tiny int glue, negligible next to the logits traffic.
        r = jnp.arange(n_pad, dtype=jnp.int32)
        if self.packed_input:
            b_of = jnp.clip(jnp.searchsorted(batch_offset, r, side='right'),
                            0, B - 1).astype(jnp.int32)
            u_of = (r - starts[b_of]) % (g_len[b_of] + 1)
        else:
            b_of = jnp.clip(r // (T * U1), 0, B - 1).astype(jnp.int32)
            u_of = r % U1
        lbl_row = y_pad[b_of, jnp.clip(u_of, 0, U)].reshape(n_pad, 1)

        row_lp = pl.pallas_call(
            functools.partial(_row_logprob_kernel, blank_idx=self.blank_idx),
            out_shape=jax.ShapeDtypeStruct((n_pad, 2), jnp.float32),
            grid=(n_pad // chunk,),
            in_specs=[pl.BlockSpec((chunk, V), lambda i: (i, 0)),
                      pl.BlockSpec((chunk, 1), lambda i: (i, 0))],
            out_specs=pl.BlockSpec((chunk, 2), lambda i: (i, 0)),
            compiler_params=pltpu.CompilerParams(
                dimension_semantics=("parallel",),
                vmem_limit_bytes=32 * 1024 * 1024),
        )(rows_p, lbl_row)

        # -------- gather per-row values into small (T, B_pad, U1) tables ------
        BS = self.BS
        b_padn = _round_up(B, BS)
        grps = b_padn // BS
        f_p = jnp.pad(f_len, (0, b_padn - B))
        g_p = jnp.pad(g_len, (0, b_padn - B))
        t_i = jnp.arange(T, dtype=jnp.int32)[:, None, None]
        b_i = jnp.arange(b_padn, dtype=jnp.int32)[None, :, None]
        u_i = jnp.arange(U1, dtype=jnp.int32)[None, None, :]
        g1 = g_p[b_i] + 1
        valid = (t_i < f_p[b_i]) & (u_i < g1) & (b_i < B)
        if self.packed_input:
            s_p = jnp.pad(starts, (0, b_padn - B))
            flat = s_p[b_i] + t_i * g1 + u_i
        else:
            flat = b_i * (T * U1) + t_i * U1 + u_i
        flat = jnp.where(valid, flat, 0)
        blank_tab = jnp.where(valid, row_lp[flat, 0], NEG)    # (T, B_pad, U1) f32
        emit_tab = jnp.where(valid, row_lp[flat, 1], NEG)     # (T, B_pad, U1) f32

        f_bc = jnp.broadcast_to(f_p[:, None], (b_padn, U1)).astype(jnp.int32)
        g_bc = jnp.broadcast_to(g_p[:, None], (b_padn, U1)).astype(jnp.int32)
        maxf = jnp.minimum(jnp.max(f_p.reshape(grps, BS), axis=1),
                           T).astype(jnp.int32)

        # -------- kernel B: 8-wide batched alpha recursion ---------------------
        losses = pl.pallas_call(
            _alpha_kernel,
            out_shape=jax.ShapeDtypeStruct((b_padn, 1), jnp.float32),
            grid_spec=pltpu.PrefetchScalarGridSpec(
                num_scalar_prefetch=1,
                grid=(grps,),
                in_specs=[
                    pl.BlockSpec((T, BS, U1), lambda i, mf: (0, i, 0)),
                    pl.BlockSpec((T, BS, U1), lambda i, mf: (0, i, 0)),
                    pl.BlockSpec((BS, U1), lambda i, mf: (i, 0)),
                    pl.BlockSpec((BS, U1), lambda i, mf: (i, 0)),
                ],
                out_specs=pl.BlockSpec((BS, 1), lambda i, mf: (i, 0)),
            ),
            compiler_params=pltpu.CompilerParams(
                dimension_semantics=("parallel",),
                vmem_limit_bytes=32 * 1024 * 1024),
        )(maxf, blank_tab, emit_tab, f_bc, g_bc)

        return jnp.sum(losses[:B, 0]) / B     # .mean() over the batch


# --------------------- pure-numpy reference (packed layout) --------------------
def _ref_loss_packed(packed, f_len, y, y_len, blank_idx, batch_offset):
    packed = np.asarray(packed, dtype=np.float64)
    losses = []
    for b in range(y.shape[0]):
        fb, gb = int(f_len[b]), int(y_len[b])
        u1 = gb + 1
        start = int(batch_offset[b]) - fb * u1
        x = packed[start:start + fb * u1].reshape(fb, u1, -1)
        m = x.max(axis=-1, keepdims=True)
        logp = x - (m + np.log(np.exp(x - m).sum(axis=-1, keepdims=True)))
        alpha = np.full((fb, u1), -np.inf)
        alpha[0, 0] = 0.0
        for t in range(fb):
            for u in range(u1):
                if t == 0 and u == 0:
                    continue
                top = alpha[t - 1, u] + logp[t - 1, u, blank_idx] if t > 0 else -np.inf
                left = (alpha[t, u - 1] + logp[t, u - 1, int(y[b, u - 1])]
                        if u > 0 else -np.inf)
                alpha[t, u] = np.logaddexp(top, left)
        losses.append(-(alpha[fb - 1, gb] + logp[fb - 1, gb, blank_idx]))
    return float(np.mean(losses))


if __name__ == "__main__":
    key = jax.random.PRNGKey(0)
    B, U, V = 2, 5, 16
    blank_idx = 0
    max_f_len = 8
    f_len = jnp.array([8, 6], dtype=jnp.int32)
    y_len = jnp.array([5, 3], dtype=jnp.int32)

    k1, k2 = jax.random.split(key)
    total_rows = int(jnp.sum(f_len * (y_len + 1)))      # packed (t,u) rows
    packed_logits = jax.random.normal(k1, (total_rows, V), dtype=jnp.float32)
    y = jax.random.randint(k2, (B, U), 1, V, dtype=jnp.int32)
    batch_offset = jnp.cumsum(f_len * (y_len + 1)).astype(jnp.int32)
    dict_meta_data = {'batch_offset': batch_offset, 'max_f_len': max_f_len}

    loss_mod = ApexTransducerLossPallas(blank_idx=blank_idx, precision='fp32',
                                        packed_input=True)
    loss = loss_mod(packed_logits, f_len, y, y_len, dict_meta_data)
    loss = jax.block_until_ready(loss)

    ref = _ref_loss_packed(np.array(packed_logits), np.array(f_len), np.array(y),
                           np.array(y_len), blank_idx, np.array(batch_offset))
    assert abs(float(loss) - ref) < 1e-3 * max(1.0, abs(ref)), (float(loss), ref)

    # TODO(synk): apex's fused CUDA backward (per-sample gradients) is not
    # implemented; only the forward mean loss is reproduced here.
    print("KERNEL_OK")
</pallas_src>

<mosaic_0001>
module attributes {stable_mosaic.version = 11 : i64} {
  func.func @_row_logprob_kernel(%arg0: i32, %arg1: memref<72x16xf32, #tpu.memory_space<vmem>>, %arg2: memref<72x1xi32, #tpu.memory_space<vmem>>, %arg3: memref<72x2xf32, #tpu.memory_space<vmem>>) attributes {dimension_semantics = [#tpu.dimension_semantics<parallel>], iteration_bounds = array<i64: 1>, scalar_prefetch = 0 : i64, scratch_operands = 0 : i64, tpu.core_type = #tpu.core_type<tc>, window_params = [{transform_indices = @transform_0, window_bounds = array<i64: 72, 16>}, {transform_indices = @transform_1, window_bounds = array<i64: 72, 1>}, {transform_indices = @transform_2, window_bounds = array<i64: 72, 2>}]} {
    %c0 = arith.constant 0 : index
    %c0_0 = arith.constant 0 : index
    %0 = vector.load %arg1[%c0, %c0_0] : memref<72x16xf32, #tpu.memory_space<vmem>>, vector<72x16xf32>
    %c0_1 = arith.constant 0 : index
    %c0_2 = arith.constant 0 : index
    %1 = vector.load %arg2[%c0_1, %c0_2] : memref<72x1xi32, #tpu.memory_space<vmem>>, vector<72x1xi32>
    %cst = arith.constant dense<0xFF800000> : vector<72xf32>
    %2 = vector.multi_reduction <maximumf>, %0, %cst [1] : vector<72x16xf32> to vector<72xf32>
    %3 = vector.shape_cast %2 : vector<72xf32> to vector<72x1xf32>
    %4 = vector.broadcast %3 : vector<72x1xf32> to vector<72x16xf32>
    %5 = arith.subf %0, %4 : vector<72x16xf32>
    %6 = math.exp %5 : vector<72x16xf32>
    %cst_3 = arith.constant dense<0.000000e+00> : vector<72xf32>
    %7 = vector.multi_reduction <add>, %6, %cst_3 [1] : vector<72x16xf32> to vector<72xf32>
    %8 = vector.shape_cast %7 : vector<72xf32> to vector<72x1xf32>
    %9 = math.log %8 : vector<72x1xf32>
    %10 = arith.addf %3, %9 : vector<72x1xf32>
    %11 = tpu.iota {dimensions = array<i32: 1>} : vector<72x16xi32>
    %12 = vector.broadcast %1 : vector<72x1xi32> to vector<72x16xi32>
    %13 = arith.cmpi eq, %11, %12 : vector<72x16xi32>
    %cst_4 = arith.constant 0.000000e+00 : f32
    %14 = vector.broadcast %cst_4 : f32 to vector<72x16xf32>
    %15 = arith.select %13, %0, %14 : vector<72x16xi1>, vector<72x16xf32>
    %cst_5 = arith.constant dense<0.000000e+00> : vector<72xf32>
    %16 = vector.multi_reduction <add>, %15, %cst_5 [1] : vector<72x16xf32> to vector<72xf32>
    %17 = vector.shape_cast %16 : vector<72xf32> to vector<72x1xf32>
    %18 = vector.extract_strided_slice %0 {offsets = [0, 0], sizes = [72, 1], strides = [1, 1]} : vector<72x16xf32> to vector<72x1xf32>
    %19 = arith.subf %18, %10 : vector<72x1xf32>
    %20 = arith.subf %17, %10 : vector<72x1xf32>
    %21 = tpu.concatenate %19, %20 in 1 : vector<72x1xf32>, vector<72x1xf32> -> vector<72x2xf32>
    %c0_6 = arith.constant 0 : index
    %c0_7 = arith.constant 0 : index
    %22 = vector.load %arg3[%c0_6, %c0_7] : memref<72x2xf32, #tpu.memory_space<vmem>>, vector<72x2xf32>
    tpu.vector_store %arg3[%c0_6, %c0_7], %21 {strides = array<i32>} : memref<72x2xf32, #tpu.memory_space<vmem>>, vector<72x2xf32>,
    return
  }
  func.func @transform_0(%arg0: i32) -> (i32, i32) {
    %c0_i32 = arith.constant 0 : i32
    %c0_i32_0 = arith.constant 0 : i32
    return %arg0, %c0_i32 : i32, i32
  }
  func.func @transform_1(%arg0: i32) -> (i32, i32) {
    %c0_i32 = arith.constant 0 : i32
    %c0_i32_0 = arith.constant 0 : i32
    return %arg0, %c0_i32 : i32, i32
  }
  func.func @transform_2(%arg0: i32) -> (i32, i32) {
    %c0_i32 = arith.constant 0 : i32
    %c0_i32_0 = arith.constant 0 : i32
    return %arg0, %c0_i32 : i32, i32
  }
}

</mosaic_0001>

<bundles_post_ra>
// kernel: tpu_custom_call.1
= control target key start
LH: loop header
LB: loop body
LE: loop exit
PB: predicated region body
PF: predicated region fallthrough
CT: control target
= control target key end

     0   :  { %vm29_vm0 = vcmask 130048   ;;  %v293_v3 = vmov 0   ;;  %v138_v60 = vlaneseq  ;;  %vm230_vm10 = vcmask 7168   ;;  %s525_s0 = inlined_call_operand.vmem [shape: f32[72,16], index: 0, kind: input, shape index: {}]   ;;  %s526_s1 = inlined_call_operand.vmem [shape: s32[72,1], index: 1, kind: input, shape index: {}]   ;;  %s527_s2 = inlined_call_operand.vmem [shape: f32[72,2], index: 2, kind: output, shape index: {}]  }
   0x1   :  { %v312_v0 = vld [vmem:[%s525_s0 + $0x10] sm:$0xff]  ;;  %v317_v1 = vld [vmem:[%s525_s0] sm:$0xff]  ;;  %v322_v2 = vld [vmem:[%s525_s0 + $0x18] sm:$0xff]  ;;  %255 = vset.pattern.permute.xlu1 %v293_v3  ;;  %256 = vset.pattern.permute.xlu0 %v293_v3  ;;  %vm240_vm11 = vcmask 15360  }
   0x2   :  { %v36_v4 = vsel %vm29_vm0, %v312_v0, -inf  ;;  %v30_v5 = vsel %vm29_vm0, %v317_v1, -inf  ;;  %v331_v6 = vld [vmem:[%s525_s0 + $0x8] sm:$0xff]  ;;  %v39_v7 = vsel %vm29_vm0, %v322_v2, -inf  ;;  %v345_v10 = vld [vmem:[%s525_s0 + $0x20] sm:$0xff]  ;;  %v354_v13 = vld [vmem:[%s525_s0 + $0x38] sm:$0xff] }
   0x3   :  { %37 = vmax.xlane.f32.xlu1 %v36_v4  ;;  %31 = vmax.xlane.f32.xlu0 %v30_v5  ;;  %v33_v8 = vsel %vm29_vm0, %v331_v6, -inf  ;;  %v340_v9 = vld [vmem:[%s525_s0 + $0x28] sm:$0xff]  ;;  %v42_v12 = vsel %vm29_vm0, %v345_v10, -inf  ;;  %v359_v14 = vld [vmem:[%s525_s0 + $0x30] sm:$0xff]  ;;  %v51_v15 = vsel %vm29_vm0, %v354_v13, -inf  ;;  %v368_v17 = vld [vmem:[%s525_s0 + $0x40] sm:$0xff] }
   0x4   :  { %v45_v11 = vsel %vm29_vm0, %v340_v9, -inf  ;;  %v48_v16 = vsel %vm29_vm0, %v359_v14, -inf  ;;  %v54_v18 = vsel %vm29_vm0, %v368_v17, -inf  ;;  %v20_v19 = vld [vmem:[%s526_s1] sm:$0xff]  ;;  %v22_v20 = vld [vmem:[%s526_s1 + $0x10] sm:$0xff]  ;;  %v23_v21 = vld [vmem:[%s526_s1 + $0x18] sm:$0xff] }
   0x5   :  { %v21_v22 = vld [vmem:[%s526_s1 + $0x8] sm:$0xff]  ;;  %v24_v23 = vld [vmem:[%s526_s1 + $0x20] sm:$0xff]  ;;  %v26_v25 = vld [vmem:[%s526_s1 + $0x30] sm:$0xff] }
   0x6   :  { %v25_v24 = vld [vmem:[%s526_s1 + $0x28] sm:$0xff]  ;;  %v27_v26 = vld [vmem:[%s526_s1 + $0x38] sm:$0xff]  ;;  %v28_v27 = vld [vmem:[%s526_s1 + $0x40] sm:$0xff] }
   0x7   :  { %40 = vmax.xlane.f32.xlu1 %v39_v7  ;;  %34 = vmax.xlane.f32.xlu0 %v33_v8  ;;  %v139_v7 = vand.u32 127, %v138_v60 }
   0xb   :  { %46 = vmax.xlane.f32.xlu1 %v45_v11  ;;  %43 = vmax.xlane.f32.xlu0 %v42_v12 }
   0xf   :  { %52 = vmax.xlane.f32.xlu1 %v51_v15  ;;  %49 = vmax.xlane.f32.xlu0 %v48_v16 }
  0x13   :  { %55 = vmax.xlane.f32.xlu0 %v54_v18 }
  0x20   :  { %141 = vperm.xlu1 %255, %v20_v19  }
  0x24   :  { %147 = vperm.xlu1 %255, %v22_v20  }
  0x28   :  { %150 = vperm.xlu1 %255, %v23_v21  }
  0x29   :  { %144 = vperm.xlu0 %256, %v21_v22  }
  0x2c   :  { %153 = vperm.xlu1 %255, %v24_v23  }
  0x30   :  { %156 = vperm.xlu1 %255, %v25_v24  }
  0x34   :  { %159 = vperm.xlu1 %255, %v26_v25  }
  0x38   :  { %162 = vperm.xlu1 %255, %v27_v26  }
  0x3c   :  { %165 = vperm.xlu1 %255, %v28_v27  }
  0x8c   :  { %v399_v28 = vpop.xlane.xlu1 %37  ;;  %v401_v29 = vpop.xlane.xlu0 %31 }
  0x8d   :  { %v57_v30 = vsub.f32 %v317_v1, %v401_v29  ;;  %v59_v32 = vsub.f32 %v312_v0, %v399_v28 }
  0x8f   :  { %v66_v31 = vmul.f32 1.442695, %v57_v30  ;;  %v70_v39 = vmul.f32 1.442695, %v59_v32 }
  0x90   :  { %v407_v33 = vpop.xlane.xlu1 %40  ;;  %v409_v34 = vpop.xlane.xlu0 %34 }
  0x91   :  { %v60_v35 = vsub.f32 %v322_v2, %v407_v33  ;;  %v58_v36 = vsub.f32 %v331_v6, %v409_v34  ;;  %257 = vpow2.f32 %v66_v31 }
  0x93   :  { %v72_v37 = vmul.f32 1.442695, %v60_v35  ;;  %v68_v38 = vmul.f32 1.442695, %v58_v36 }
  0x94   :  { %v415_v40 = vpop.xlane.xlu1 %46  ;;  %v417_v41 = vpop.xlane.xlu0 %43 }
  0x95   :  { %259 = vpow2.f32 %v72_v37  ;;  %v62_v42 = vsub.f32 %v340_v9, %v415_v40  ;;  %v61_v43 = vsub.f32 %v345_v10, %v417_v41 }
  0x96   :  { %261 = vpow2.f32 %v68_v38 }
  0x97   :  { %v76_v44 = vmul.f32 1.442695, %v62_v42  ;;  %v74_v45 = vmul.f32 1.442695, %v61_v43  ;;  %263 = vpow2.f32 %v70_v39 }
  0x98   :  { %v423_v46 = vpop.xlane.xlu1 %52  ;;  %v425_v47 = vpop.xlane.xlu0 %49 }
  0x99   :  { %265 = vpow2.f32 %v76_v44  ;;  %v64_v48 = vsub.f32 %v354_v13, %v423_v46  ;;  %v63_v49 = vsub.f32 %v359_v14, %v425_v47 }
  0x9a   :  { %267 = vpow2.f32 %v74_v45 }
  0x9b   :  { %v80_v50 = vmul.f32 1.442695, %v64_v48  ;;  %v78_v51 = vmul.f32 1.442695, %v63_v49 }
  0x9c   :  { %v142_v52 = vpop.permute.xlu1 %141  ;;  %v431_v53 = vpop.xlane.xlu0 %55 }
  0x9d   :  { %269 = vpow2.f32 %v80_v50  ;;  %v65_v54 = vsub.f32 %v368_v17, %v431_v53  ;;  %vm167_vm1 = vcmp.eq.s32.totalorder %v139_v7, %v142_v52 }
  0x9e   :  { %271 = vpow2.f32 %v78_v51  ;;  %v258_v55 = vpop.eup %257  ;;  %v176_v22 = vsel %vm167_vm1, %v317_v1, 0.0 }
  0x9f   :  { %v82_v56 = vmul.f32 1.442695, %v65_v54  ;;  %v84_v58 = vsel %vm29_vm0, %v258_v55, 0.0  ;;  %v185_v27 = vsel %vm29_vm0, %v176_v22, 0.0 }
  0xa0   :  { %v148_v57 = vpop.permute.xlu1 %147  ;;  %85 = vadd.xlane.f32.xlu1 %v84_v58 }
  0xa1   :  { %273 = vpow2.f32 %v82_v56  ;;  %vm169_vm2 = vcmp.eq.s32.totalorder %v139_v7, %v148_v57 }
  0xa2   :  { %v260_v59 = vpop.eup %259  ;;  %v178_v30 = vsel %vm169_vm2, %v312_v0, 0.0 }
  0xa3   :  { %v262_v61 = vpop.eup %261  ;;  %v93_v62 = vsel %vm29_vm0, %v260_v59, 0.0  ;;  %v191_v36 = vsel %vm29_vm0, %v178_v30, 0.0 }
  0xa4   :  { %v151_v63 = vpop.permute.xlu1 %150  ;;  %v87_v3 = vsel %vm29_vm0, %v262_v61, 0.0  ;;  %v264_v4 = vpop.eup %263  ;;  %94 = vadd.xlane.f32.xlu1 %v93_v62 }
  0xa5   :  { %88 = vadd.xlane.f32.xlu0 %v87_v3  ;;  %v90_v15 = vsel %vm29_vm0, %v264_v4, 0.0  ;;  %v145_v23 = vpop.permute.xlu0 %144  ;;  %vm170_vm5 = vcmp.eq.s32.totalorder %v139_v7, %v151_v63 }
  0xa6   :  { %v266_v5 = vpop.eup %265  ;;  %vm168_vm3 = vcmp.eq.s32.totalorder %v139_v7, %v145_v23  ;;  %v179_v44 = vsel %vm170_vm5, %v322_v2, 0.0 }
  0xa7   :  { %v268_v8 = vpop.eup %267  ;;  %v99_v11 = vsel %vm29_vm0, %v266_v5, 0.0  ;;  %v177_v32 = vsel %vm168_vm3, %v331_v6, 0.0  ;;  %v194_v48 = vsel %vm29_vm0, %v179_v44, 0.0 }
  0xa8   :  { %v154_v12 = vpop.permute.xlu1 %153  ;;  %100 = vadd.xlane.f32.xlu1 %v99_v11  ;;  %v96_v18 = vsel %vm29_vm0, %v268_v8, 0.0  ;;  %v188_v38 = vsel %vm29_vm0, %v177_v32, 0.0 }
  0xa9   :  { %91 = vadd.xlane.f32.xlu0 %v90_v15  ;;  %vm171_vm4 = vcmp.eq.s32.totalorder %v139_v7, %v154_v12 }
  0xaa   :  { %v270_v16 = vpop.eup %269  ;;  %v180_v37 = vsel %vm171_vm4, %v345_v10, 0.0 }
  0xab   :  { %v272_v19 = vpop.eup %271  ;;  %v105_v20 = vsel %vm29_vm0, %v270_v16, 0.0  ;;  %v197_v42 = vsel %vm29_vm0, %v180_v37, 0.0 }
  0xac   :  { %v157_v21 = vpop.permute.xlu1 %156  ;;  %106 = vadd.xlane.f32.xlu1 %v105_v20  ;;  %v102_v24 = vsel %vm29_vm0, %v272_v19, 0.0 }
  0xad   :  { %97 = vadd.xlane.f32.xlu0 %v96_v18  ;;  %vm172_vm7 = vcmp.eq.s32.totalorder %v139_v7, %v157_v21 }
  0xae   :  { %v274_v25 = vpop.eup %273  ;;  %v181_v50 = vsel %vm172_vm7, %v340_v9, 0.0 }
  0xaf   :  { %v108_v31 = vsel %vm29_vm0, %v274_v25, 0.0  ;;  %v200_v52 = vsel %vm29_vm0, %v181_v50, 0.0 }
  0xb0   :  { %v160_v26 = vpop.permute.xlu1 %159  ;;  %186 = vadd.xlane.f32.xlu1 %v185_v27 }
  0xb1   :  { %103 = vadd.xlane.f32.xlu0 %v102_v24  ;;  %vm173_vm6 = vcmp.eq.s32.totalorder %v139_v7, %v160_v26 }
  0xb2   :  { %v182_v43 = vsel %vm173_vm6, %v359_v14, 0.0 }
  0xb3   :  { %v203_v45 = vsel %vm29_vm0, %v182_v43, 0.0 }
  0xb4   :  { %v163_v35 = vpop.permute.xlu1 %162  ;;  %192 = vadd.xlane.f32.xlu1 %v191_v36 }
  0xb5   :  { %109 = vadd.xlane.f32.xlu0 %v108_v31  ;;  %vm174_vm9 = vcmp.eq.s32.totalorder %v139_v7, %v163_v35 }
  0xb6   :  { %v183_v54 = vsel %vm174_vm9, %v354_v13, 0.0 }
  0xb7   :  { %v206_v55 = vsel %vm29_vm0, %v183_v54, 0.0 }
  0xb8   :  { %v166_v39 = vpop.permute.xlu1 %165  ;;  %198 = vadd.xlane.f32.xlu1 %v197_v42 }
  0xb9   :  { %189 = vadd.xlane.f32.xlu0 %v188_v38  ;;  %vm175_vm8 = vcmp.eq.s32.totalorder %v139_v7, %v166_v39 }
  0xba   :  { %v184_v49 = vsel %vm175_vm8, %v368_v17, 0.0 }
  0xbb   :  { %v209_v51 = vsel %vm29_vm0, %v184_v49, 0.0 }
  0xbc   :  { %204 = vadd.xlane.f32.xlu1 %v203_v45 }
  0xbd   :  { %195 = vadd.xlane.f32.xlu0 %v194_v48 }
  0xc0   :  { %210 = vadd.xlane.f32.xlu1 %v209_v51 }
  0xc1   :  { %201 = vadd.xlane.f32.xlu0 %v200_v52 }
  0xc5   :  { %207 = vadd.xlane.f32.xlu0 %v206_v55 }
 0x129   :  { %v86_v56 = vpop.xlane.xlu1 %85 }
 0x12a   :  { %275 = vlog2.f32 %v86_v56 }
 0x12d   :  { %v95_v57 = vpop.xlane.xlu1 %94 }
 0x12e   :  { %v89_v58 = vpop.xlane.xlu0 %88  ;;  %277 = vlog2.f32 %v95_v57 }
 0x12f   :  { %279 = vlog2.f32 %v89_v58 }
 0x131   :  { %v101_v59 = vpop.xlane.xlu1 %100 }
 0x132   :  { %v92_v60 = vpop.xlane.xlu0 %91  ;;  %281 = vlog2.f32 %v101_v59 }
 0x133   :  { %283 = vlog2.f32 %v92_v60 }
 0x135   :  { %v107_v61 = vpop.xlane.xlu1 %106 }
 0x136   :  { %v98_v62 = vpop.xlane.xlu0 %97  ;;  %285 = vlog2.f32 %v107_v61 }
 0x137   :  { %v276_v63 = vpop.eup %275  ;;  %287 = vlog2.f32 %v98_v62 }
 0x138   :  { %v112_v3 = vmul.f32 0.6931472, %v276_v63 }
 0x139   :  { %v187_v4 = vpop.xlane.xlu1 %186 }
 0x13a   :  { %v104_v5 = vpop.xlane.xlu0 %103  ;;  %v129_v7 = vadd.f32 %v112_v3, %v401_v29 }
 0x13b   :  { %289 = vlog2.f32 %v104_v5  ;;  %v278_v8 = vpop.eup %277 }
 0x13c   :  { %v280_v11 = vpop.eup %279  ;;  %v212_v12 = vsub.f32 %v317_v1, %v129_v7  ;;  %v221_v15 = vsub.f32 %v187_v4, %v129_v7  ;;  %v118_v20 = vmul.f32 0.6931472, %v278_v8 }
 0x13d   :  { %v114_v16 = vmul.f32 0.6931472, %v280_v11  ;;  %v193_v18 = vpop.xlane.xlu1 %192 }
 0x13e   :  { %v110_v19 = vpop.xlane.xlu0 %109  ;;  %v231_v21 = vsel %vm230_vm10, %v212_v12, %v221_v15  ;;  %v132_v30 = vadd.f32 %v118_v20, %v407_v33 }
 0x13f   :  { %291 = vlog2.f32 %v110_v19  ;;  %v282_v22 = vpop.eup %281  ;;  %241 = vst.msk [vmem:[%s527_s2] sm:$0xff] %vm240_vm11, %v231_v21  ;;  %v130_v29 = vadd.f32 %v114_v16, %v409_v34 }
 0x140   :  { %v284_v23 = vpop.eup %283  ;;  %v122_v25 = vmul.f32 0.6931472, %v282_v22  ;;  %v215_v33 = vsub.f32 %v322_v2, %v132_v30 }
 0x141   :  { %v116_v24 = vmul.f32 0.6931472, %v284_v23  ;;  %v213_v26 = vsub.f32 %v331_v6, %v130_v29  ;;  %v199_v35 = vpop.xlane.xlu1 %198 }
 0x142   :  { %v190_v1 = vpop.xlane.xlu0 %189 }
 0x143   :  { %v222_v27 = vsub.f32 %v190_v1, %v130_v29  ;;  %v286_v31 = vpop.eup %285  ;;  %v131_v32 = vadd.f32 %v116_v24, %v399_v28  ;;  %v134_v28 = vadd.f32 %v122_v25, %v415_v40 }
 0x144   :  { %v288_v36 = vpop.eup %287  ;;  %v126_v42 = vmul.f32 0.6931472, %v286_v31 }
 0x145   :  { %v232_v37 = vsel %vm230_vm10, %v213_v26, %v222_v27  ;;  %v120_v38 = vmul.f32 0.6931472, %v288_v36  ;;  %v214_v39 = vsub.f32 %v312_v0, %v131_v32  ;;  %v223_v34 = vsub.f32 %v193_v18, %v131_v32  ;;  %v205_v2 = vpop.xlane.xlu1 %204 }
 0x146   :  { %242 = vst.msk [vmem:[%s527_s2 + $0x8] sm:$0xff] %vm240_vm11, %v232_v37  ;;  %v196_v6 = vpop.xlane.xlu0 %195  ;;  %v217_v52 = vsub.f32 %v340_v9, %v134_v28  ;;  %v136_v55 = vadd.f32 %v126_v42, %v423_v46 }
 0x147   :  { %v224_v43 = vsub.f32 %v196_v6, %v132_v30  ;;  %v233_v45 = vsel %vm230_vm10, %v214_v39, %v223_v34  ;;  %v133_v48 = vadd.f32 %v120_v38, %v417_v41 }
 0x148   :  { %v290_v44 = vpop.eup %289  ;;  %243 = vst.msk [vmem:[%s527_s2 + $0x10] sm:$0xff] %vm240_vm11, %v233_v45  ;;  %v219_v61 = vsub.f32 %v354_v13, %v136_v55 }
 0x149   :  { %v124_v49 = vmul.f32 0.6931472, %v290_v44  ;;  %v234_v0 = vsel %vm230_vm10, %v215_v33, %v224_v43  ;;  %v216_v50 = vsub.f32 %v345_v10, %v133_v48  ;;  %v225_v51 = vsub.f32 %v199_v35, %v133_v48 }
 0x14a   :  { %244 = vst.msk [vmem:[%s527_s2 + $0x18] sm:$0xff] %vm240_vm11, %v234_v0  ;;  %v202_v40 = vpop.xlane.xlu0 %201 }
 0x14b   :  { %v135_v41 = vadd.f32 %v124_v49, %v425_v47  ;;  %v226_v54 = vsub.f32 %v202_v40, %v134_v28  ;;  %v235_v57 = vsel %vm230_vm10, %v216_v50, %v225_v51 }
 0x14c   :  { %v292_v56 = vpop.eup %291  ;;  %245 = vst.msk [vmem:[%s527_s2 + $0x20] sm:$0xff] %vm240_vm11, %v235_v57 }
 0x14d   :  { %v128_v58 = vmul.f32 0.6931472, %v292_v56  ;;  %v218_v10 = vsub.f32 %v359_v14, %v135_v41  ;;  %v227_v59 = vsub.f32 %v205_v2, %v135_v41  ;;  %v236_v60 = vsel %vm230_vm10, %v217_v52, %v226_v54  ;;  %v211_v14 = vpop.xlane.xlu1 %210 }
 0x14e   :  { %246 = vst.msk [vmem:[%s527_s2 + $0x28] sm:$0xff] %vm240_vm11, %v236_v60  ;;  %v208_v9 = vpop.xlane.xlu0 %207 }
 0x14f   :  { %v237_v46 = vsel %vm230_vm10, %v218_v10, %v227_v59  ;;  %v137_v47 = vadd.f32 %v128_v58, %v431_v53  ;;  %v228_v62 = vsub.f32 %v208_v9, %v136_v55 }
 0x150   :  { %247 = vst.msk [vmem:[%s527_s2 + $0x30] sm:$0xff] %vm240_vm11, %v237_v46 }
 0x151   :  { %v220_v63 = vsub.f32 %v368_v17, %v137_v47  ;;  %v229_v3 = vsub.f32 %v211_v14, %v137_v47  ;;  %v238_v4 = vsel %vm230_vm10, %v219_v61, %v228_v62 }
 0x152   :  { %248 = vst.msk [vmem:[%s527_s2 + $0x38] sm:$0xff] %vm240_vm11, %v238_v4 }
 0x153   :  { %v239_v53 = vsel %vm230_vm10, %v220_v63, %v229_v3 }
 0x154   :  { %249 = vst.msk [vmem:[%s527_s2 + $0x40] sm:$0xff] %vm240_vm11, %v239_v53 }

</bundles_post_ra>
